<compile_context>
chip_gen: v7x
topology: tpu7x:2x2x1
jax: 0.10.0
libtpu: 0.0.40
codegen_flags: <defaults>
</compile_context>

<pallas_src>
import functools

import jax
import jax.numpy as jnp
from jax.experimental import pallas as pl
from jax.experimental.pallas import tpu as pltpu


def _ls_ce_kernel(logits_ref, targets_ref, loss_ref, *,
                  smoothing, num_classes, block_rows, total_rows):
    """One (TN, C) logits tile -> (1, 1) partial sum of per-row smoothed CE."""
    x = logits_ref[...]                                   # (TN, C) native dtype
    t = targets_ref[...]                                  # (TN, 1) int32

    # Row-wise pieces of: loss_r = lse_r - (1-s)*x[r, t_r] - (s/C)*sum_c x[r, c]
    m = jnp.max(x, axis=-1, keepdims=True)                # (TN, 1) native dtype
    # Upcast only the exp argument; accumulate in f32.
    sumexp = jnp.sum(jnp.exp((x - m).astype(jnp.float32)),
                     axis=-1, keepdims=True)              # (TN, 1) f32
    lse = m.astype(jnp.float32) + jnp.log(sumexp)         # (TN, 1) f32

    sum_x = jnp.sum(x, axis=-1, keepdims=True, dtype=jnp.float32)      # (TN, 1)

    # x[row, t[row]] via compare-vs-iota + select + row sum (no scatter,
    # no materialized one-hot / smoothed-target tensors).
    col = jax.lax.broadcasted_iota(jnp.int32, x.shape, 1)               # (TN, C)
    tgt = jnp.sum(jnp.where(col == t, x, jnp.zeros_like(x)),
                  axis=-1, keepdims=True, dtype=jnp.float32)            # (TN, 1)

    s = smoothing
    c = float(num_classes)
    per_row = lse - (1.0 - s) * tgt - (s / c) * sum_x                   # (TN, 1)

    # Mask rows of the final partial block (their logits are stale VMEM data,
    # possibly inf/nan after exp -> jnp.where keeps them out of the sum).
    row = (jax.lax.broadcasted_iota(jnp.int32, (block_rows, 1), 0)
           + pl.program_id(0) * block_rows)
    per_row = jnp.where(row < total_rows, per_row, 0.0)

    # One scalar per grid step: distinct (1, 1) output block per step, so the
    # grid axis can stay "parallel"; the tiny final mean happens in the wrapper.
    loss_ref[...] = jnp.sum(per_row, axis=0, keepdims=True)


def _sublane_multiple(dtype):
    # f32 -> 8, bf16/f16 -> 16, int8/fp8 -> 32 (sub-32-bit dtypes pack sublanes).
    return max(8, 32 // jnp.dtype(dtype).itemsize)


def _round_up(v, m):
    return ((v + m - 1) // m) * m


def _round_down(v, m):
    return (v // m) * m


def _vmem_limit_bytes():
    """Generation-aware scoped-VMEM budget (conservative fallback if unknown)."""
    try:
        cap = int(pltpu.get_tpu_info().vmem_capacity_bytes)
    except Exception:
        return 32 * 1024 * 1024
    if cap >= 100 * 1024 * 1024:            # v5e / v6e: 128 MiB physical VMEM
        return 64 * 1024 * 1024
    # v7x-class parts (64 MiB physical): leave compiler headroom (~40 MiB).
    return max(16 * 1024 * 1024, min(40 * 1024 * 1024, (cap * 5) // 8))


def _pick_tile_rows(n, c, dtype, vmem_limit):
    """Rows per block, sized in bytes and rounded to the dtype sublane multiple."""
    sub = _sublane_multiple(dtype)
    if n <= sub:
        return int(n)                        # single full-dim block
    itemsize = jnp.dtype(dtype).itemsize
    # bf16 inputs expand ~2-3x into f32 temporaries -> smaller fraction of VMEM.
    frac = 8 if itemsize >= 4 else 12
    target_bytes = max(512 * 1024, min(4 * 1024 * 1024, vmem_limit // frac))
    # +512 B/row charges the lane-padded (TN, 1) int32 target block to the budget.
    bytes_per_row = c * itemsize + 512
    tn = max(sub, _round_down(target_bytes // bytes_per_row, sub))
    # Keep >= 2 grid steps so the "parallel" axis can shard across TensorCores
    # on multi-TC parts (v7x megacore); costs one ~0.35us step elsewhere.
    tn = min(tn, _round_up(pl.cdiv(n, 2), sub))
    return int(tn)


def label_smoothing_cross_entropy(logits, targets, smoothing=0.1, tile_rows=None):
    """logits: (N, C) float (f32 or bf16); targets: (N,) int. Returns scalar f32 loss."""
    n, c = logits.shape
    targets_2d = targets.astype(jnp.int32).reshape(n, 1)

    vmem_limit = _vmem_limit_bytes()
    sub = _sublane_multiple(logits.dtype)
    if tile_rows is not None:
        tn = int(tile_rows)
        # Validate user-supplied tile_rows against the dtype sublane multiple.
        tn = n if tn >= n else max(sub, _round_down(tn, sub))
    else:
        tn = _pick_tile_rows(n, c, logits.dtype, vmem_limit)

    num_blocks = int(pl.cdiv(n, tn))

    kernel = functools.partial(
        _ls_ce_kernel,
        smoothing=float(smoothing),
        num_classes=c,
        block_rows=tn,
        total_rows=n,
    )

    partial_sums = pl.pallas_call(
        kernel,
        out_shape=jax.ShapeDtypeStruct((num_blocks, 1), jnp.float32),
        grid_spec=pltpu.PrefetchScalarGridSpec(
            num_scalar_prefetch=0,
            grid=(num_blocks,),
            in_specs=[
                pl.BlockSpec((tn, c), lambda i: (i, 0)),   # (TN, C) logits tile
                pl.BlockSpec((tn, 1), lambda i: (i, 0)),   # (TN, 1) targets tile
            ],
            out_specs=pl.BlockSpec((1, 1), lambda i: (i, 0)),  # per-block partial sum
        ),
        compiler_params=pltpu.CompilerParams(
            # Each grid step touches a distinct output block -> safe to shard
            # across TensorCores (v7x megacore); neutral on v5e/v6e.
            dimension_semantics=("parallel",),
            vmem_limit_bytes=vmem_limit,
        ),
    )(logits, targets_2d)

    # Finish the mean over the TOTAL batch in the wrapper (padded edge rows were
    # already masked out of the in-kernel partial sums).
    return jnp.sum(partial_sums) / n


def _reference(logits, targets, smoothing=0.1):
    logits = logits.astype(jnp.float32)
    log_probs = jax.nn.log_softmax(logits, axis=-1)
    c = logits.shape[-1]
    onehot = jax.nn.one_hot(targets, c, dtype=jnp.float32)
    smooth = (1.0 - smoothing) * onehot + smoothing / c
    return jnp.mean(jnp.sum(-smooth * log_probs, axis=-1))


if __name__ == "__main__":
    key = jax.random.PRNGKey(0)
    k1, k2, k3, k4, k5, k6 = jax.random.split(key, 6)

    # Single-tile f32 case (class axis < 128 lanes -> full-dim block).
    N, C = 8, 32
    logits = jax.random.normal(k1, (N, C), dtype=jnp.float32)
    targets = jax.random.randint(k2, (N,), 0, C, dtype=jnp.int32)
    loss = jax.block_until_ready(
        label_smoothing_cross_entropy(logits, targets, smoothing=0.1))
    ref = _reference(logits, targets, smoothing=0.1)
    assert jnp.allclose(loss, ref, atol=1e-5, rtol=1e-5), (loss, ref)

    # Multi-tile f32 case with a partial final block: exercises the batch-tiled
    # grid, the per-block partial-sum output path, and the in-kernel row mask.
    N2, C2 = 60, 128
    logits2 = jax.random.normal(k3, (N2, C2), dtype=jnp.float32)
    targets2 = jax.random.randint(k4, (N2,), 0, C2, dtype=jnp.int32)
    loss2 = jax.block_until_ready(
        label_smoothing_cross_entropy(logits2, targets2, smoothing=0.1, tile_rows=16))
    ref2 = _reference(logits2, targets2, smoothing=0.1)
    assert jnp.allclose(loss2, ref2, atol=1e-5, rtol=1e-5), (loss2, ref2)

    # bf16 inputs stay bf16 through max/select; exp/sums accumulate in f32.
    N3, C3 = 64, 256
    logits3 = jax.random.normal(k5, (N3, C3), dtype=jnp.float32).astype(jnp.bfloat16)
    targets3 = jax.random.randint(k6, (N3,), 0, C3, dtype=jnp.int32)
    loss3 = jax.block_until_ready(
        label_smoothing_cross_entropy(logits3, targets3, smoothing=0.1))
    ref3 = _reference(logits3, targets3, smoothing=0.1)
    assert jnp.allclose(loss3, ref3, atol=5e-2, rtol=5e-2), (loss3, ref3)

    print("KERNEL_OK")
</pallas_src>

<mosaic_0001>
module attributes {stable_mosaic.version = 11 : i64} {
  func.func @_ls_ce_kernel(%arg0: i32, %arg1: memref<8x32xf32, #tpu.memory_space<vmem>>, %arg2: memref<8x1xi32, #tpu.memory_space<vmem>>, %arg3: memref<1x1xf32, #tpu.memory_space<vmem>>) attributes {dimension_semantics = [#tpu.dimension_semantics<parallel>], iteration_bounds = array<i64: 1>, scalar_prefetch = 0 : i64, scratch_operands = 0 : i64, tpu.core_type = #tpu.core_type<tc>, window_params = [{transform_indices = @transform_0, window_bounds = array<i64: 8, 32>}, {transform_indices = @transform_1, window_bounds = array<i64: 8, 1>}, {transform_indices = @transform_2, window_bounds = array<i64: 1, 1>}]} {
    %c0 = arith.constant 0 : index
    %c0_0 = arith.constant 0 : index
    %0 = vector.load %arg1[%c0, %c0_0] : memref<8x32xf32, #tpu.memory_space<vmem>>, vector<8x32xf32>
    %c0_1 = arith.constant 0 : index
    %c0_2 = arith.constant 0 : index
    %1 = vector.load %arg2[%c0_1, %c0_2] : memref<8x1xi32, #tpu.memory_space<vmem>>, vector<8x1xi32>
    %cst = arith.constant dense<0xFF800000> : vector<8xf32>
    %2 = vector.multi_reduction <maximumf>, %0, %cst [1] : vector<8x32xf32> to vector<8xf32>
    %3 = vector.shape_cast %2 : vector<8xf32> to vector<8x1xf32>
    %4 = vector.broadcast %3 : vector<8x1xf32> to vector<8x32xf32>
    %5 = arith.subf %0, %4 : vector<8x32xf32>
    %6 = math.exp %5 : vector<8x32xf32>
    %cst_3 = arith.constant dense<0.000000e+00> : vector<8xf32>
    %7 = vector.multi_reduction <add>, %6, %cst_3 [1] : vector<8x32xf32> to vector<8xf32>
    %8 = vector.shape_cast %7 : vector<8xf32> to vector<8x1xf32>
    %9 = math.log %8 : vector<8x1xf32>
    %10 = arith.addf %3, %9 : vector<8x1xf32>
    %cst_4 = arith.constant dense<0.000000e+00> : vector<8xf32>
    %11 = vector.multi_reduction <add>, %0, %cst_4 [1] : vector<8x32xf32> to vector<8xf32>
    %12 = vector.shape_cast %11 : vector<8xf32> to vector<8x1xf32>
    %13 = tpu.iota {dimensions = array<i32: 1>} : vector<8x32xi32>
    %14 = vector.broadcast %1 : vector<8x1xi32> to vector<8x32xi32>
    %15 = arith.cmpi eq, %13, %14 : vector<8x32xi32>
    %cst_5 = arith.constant 0.000000e+00 : f32
    %16 = vector.broadcast %cst_5 : f32 to vector<8x32xf32>
    %17 = arith.select %15, %0, %16 : vector<8x32xi1>, vector<8x32xf32>
    %cst_6 = arith.constant dense<0.000000e+00> : vector<8xf32>
    %18 = vector.multi_reduction <add>, %17, %cst_6 [1] : vector<8x32xf32> to vector<8xf32>
    %19 = vector.shape_cast %18 : vector<8xf32> to vector<8x1xf32>
    %cst_7 = arith.constant 0.899999976 : f32
    %20 = vector.broadcast %cst_7 : f32 to vector<8x1xf32>
    %21 = arith.mulf %20, %19 : vector<8x1xf32>
    %22 = arith.subf %10, %21 : vector<8x1xf32>
    %cst_8 = arith.constant 3.125000e-03 : f32
    %23 = vector.broadcast %cst_8 : f32 to vector<8x1xf32>
    %24 = arith.mulf %23, %12 : vector<8x1xf32>
    %25 = arith.subf %22, %24 : vector<8x1xf32>
    %26 = tpu.iota {dimensions = array<i32: 0>} : vector<8x1xi32>
    %c8_i32 = arith.constant 8 : i32
    %27 = arith.muli %arg0, %c8_i32 : i32
    %28 = vector.broadcast %27 : i32 to vector<8x1xi32>
    %29 = arith.addi %26, %28 : vector<8x1xi32>
    %c8_i32_9 = arith.constant 8 : i32
    %30 = vector.broadcast %c8_i32_9 : i32 to vector<8x1xi32>
    %31 = arith.cmpi slt, %29, %30 : vector<8x1xi32>
    %cst_10 = arith.constant 0.000000e+00 : f32
    %32 = vector.broadcast %cst_10 : f32 to vector<8x1xf32>
    %33 = arith.select %31, %25, %32 : vector<8x1xi1>, vector<8x1xf32>
    %cst_11 = arith.constant dense<0.000000e+00> : vector<1xf32>
    %34 = vector.multi_reduction <add>, %33, %cst_11 [0] : vector<8x1xf32> to vector<1xf32>
    %35 = vector.shape_cast %34 : vector<1xf32> to vector<1x1xf32>
    %c0_12 = arith.constant 0 : index
    %c0_13 = arith.constant 0 : index
    %36 = vector.load %arg3[%c0_12, %c0_13] : memref<1x1xf32, #tpu.memory_space<vmem>>, vector<1x1xf32>
    tpu.vector_store %arg3[%c0_12, %c0_13], %35 {strides = array<i32>} : memref<1x1xf32, #tpu.memory_space<vmem>>, vector<1x1xf32>,
    return
  }
  func.func @transform_0(%arg0: i32) -> (i32, i32) {
    %c0_i32 = arith.constant 0 : i32
    %c0_i32_0 = arith.constant 0 : i32
    return %arg0, %c0_i32 : i32, i32
  }
  func.func @transform_1(%arg0: i32) -> (i32, i32) {
    %c0_i32 = arith.constant 0 : i32
    %c0_i32_0 = arith.constant 0 : i32
    return %arg0, %c0_i32 : i32, i32
  }
  func.func @transform_2(%arg0: i32) -> (i32, i32) {
    %c0_i32 = arith.constant 0 : i32
    %c0_i32_0 = arith.constant 0 : i32
    return %arg0, %c0_i32 : i32, i32
  }
}

</mosaic_0001>

<bundles_post_ra>
// kernel: tpu_custom_call.1
= control target key start
LH: loop header
LB: loop body
LE: loop exit
PB: predicated region body
PF: predicated region fallthrough
CT: control target
= control target key end

     0   :  { %vm14_vm0 = vcmask 261120   ;;  %s143_s0 = inlined_call_operand.vmem [shape: f32[8,32], index: 0, kind: input, shape index: {}]   ;;  %s144_s1 = inlined_call_operand.vmem [shape: s32[8,1], index: 1, kind: input, shape index: {}]   ;;  %s145_s2 = inlined_call_operand.hbm [shape: f32[1,1], index: 2, kind: output, shape index: {}]  }
   0x1   :  { %v12_v0 = vld [vmem:[%s143_s0] sm:$0xff] }
   0x2   :  { %7 = vsyncpa [#allocation3], 0  ;;  %v15_v1 = vsel %vm14_vm0, %v12_v0, -inf  ;;  %v104_v2 = vmov 0   ;;  %v13_v3 = vld [vmem:[%s144_s1] sm:$0xff]  ;;  %v30_v7 = vlaneseq  ;;  %v27_v14 = vsel %vm14_vm0, %v12_v0, 0.0 }
   0x3   :  { %75 = vset.pattern.permute.xlu0 %v104_v2  ;;  %s105_s0 = smov [#allocation2]   ;;  %vm57_vm2 = vcmask 0  }
   0x4   :  { %16 = vmax.xlane.f32.xlu0 %v15_v1  ;;  %v31_v8 = vand.u32 127, %v30_v7  ;;  %s65_s1 = sshll.u32 %s105_s0, 4  ;;  %s66_s1 = int_to_ptr.vmem [resolvable:$true] %s65_s1 }
   0x5   :  { %s80_s13 = scalar_lea.vmem %s66_s1, 16  ;;  %s84_s14 = scalar_lea.vmem %s66_s1, 32 }
   0x6   :  { %p81_p0 = scmp.ne.s32.totalorder %s66_s1, %s80_s13  ;;  %p85_p1 = scmp.lt.s32.totalorder %s66_s1, %s66_s1 }
   0x7   :  { %p86_p2 = scmp.lt.s32.totalorder %s84_s14, %s80_s13 }
   0x9   :  { %p87_p3 = por %p86_p2, %p85_p1 }
   0xb   :  { %p88_p4 = pnand %p87_p3, %p81_p0 }
  0x1a   :  { %33 = vperm.xlu0 %75, %v13_v3  }
  0x91   :  { %v17_v4 = vpop.xlane.xlu0 %16 }
  0x92   :  { %v18_v5 = vsub.f32 %v12_v0, %v17_v4 }
  0x94   :  { %v19_v6 = vmul.f32 1.442695, %v18_v5 }
  0x96   :  { %76 = vpow2.f32 %v19_v6 }
  0x99   :  { %v34_v9 = vpop.permute.xlu0 %33 }
  0x9a   :  { %vm35_vm1 = vcmp.eq.s32.totalorder %v31_v8, %v34_v9 }
  0x9b   :  { %v36_v11 = vsel %vm35_vm1, %v12_v0, 0.0 }
  0x9c   :  { %v37_v13 = vsel %vm14_vm0, %v36_v11, 0.0 }
  0xa0   :  { %v77_v10 = vpop.eup %76 }
  0xa1   :  { %v21_v12 = vsel %vm14_vm0, %v77_v10, 0.0 }
  0xa2   :  { %22 = vadd.xlane.f32.xlu1 %v21_v12 }
  0xa6   :  { %38 = vadd.xlane.f32.xlu1 %v37_v13 }
  0xaa   :  { %28 = vadd.xlane.f32.xlu1 %v27_v14 }
 0x12f   :  { %v23_v15 = vpop.xlane.xlu1 %22 }
 0x130   :  { %78 = vlog2.f32 %v23_v15 }
 0x133   :  { %v39_v16 = vpop.xlane.xlu1 %38 }
 0x134   :  { %v40_v21 = vmul.f32 0.9, %v39_v16 }
 0x137   :  { %v29_v18 = vpop.xlane.xlu1 %28 }
 0x138   :  { %v42_v22 = vmul.f32 0.003125, %v29_v18 }
 0x13a   :  { %v79_v17 = vpop.eup %78 }
 0x13b   :  { %v25_v19 = vmul.f32 0.6931472, %v79_v17 }
 0x13d   :  { %v26_v20 = vadd.f32 %v25_v19, %v17_v4 }
 0x13f   :  { %v41_v23 = vsub.f32 %v26_v20, %v40_v21 }
 0x141   :  { %v43_v24 = vsub.f32 %v41_v23, %v42_v22 }
 0x143   :  { %v51_v25 = vrot.slane %v43_v24, 4 }
 0x145   :  { %v52_v26 = vadd.f32 %v51_v25, %v43_v24 }
 0x147   :  { %v53_v27 = vrot.slane %v52_v26, 2 }
 0x149   :  { %v54_v28 = vadd.f32 %v53_v27, %v52_v26 }
 0x14b   :  { %v55_v29 = vrot.slane %v54_v28, 1 }
 0x14d   :  { %v56_v30 = vadd.f32 %v55_v29, %v54_v28 }
 0x14f   :  { %58 = vst.msk [vmem:[#allocation2] sm:$0x1] %vm57_vm2, %v56_v30 }
 0x150   :  { %91 = shalt.err (!%p88_p4)
}
 0x151   :  { %s92_s17 = scalar_lea.hbm %s145_s2, 16 }
 0x152   :  { %p93_p5 = scmp.ne.s32.totalorder %s145_s2, %s92_s17  ;;  %p96_p6 = scmp.lt.u32.totalorder %s92_s17, %s145_s2 }
 0x154   :  { %p98_p7 = pnand %p96_p6, %p93_p5 }
 0x156   :  { %101 = shalt.err (!%p98_p7)
}
 0x157   :  { %68 = dma.vmem_to_hbm [thread:$0]  %s66_s1, 16, %s145_s2, [#allocation3]  }
 0x158   :  { %102 = dma.done.wait [#allocation3], 16  }
 0x159   :  { %103 = vsyncadd [#allocation3], 4294967280 }
 0x15a   :  { %72 = vsyncpa [#allocation3], 1 }

</bundles_post_ra>
